<compile_context>
chip_gen: v5e
topology: v5e:2x2
jax: 0.10.0
libtpu: 0.0.40
codegen_flags: <defaults>
</compile_context>

<pallas_src>
import functools

import numpy as np
import jax
import jax.numpy as jnp
from jax import lax
from jax.experimental import pallas as pl
from jax.experimental.pallas import tpu as pltpu


def _vq_kernel(T, tile_t, k_chunk, x_ref, e_ref, esq_ref, q_ref, idx_ref, stats_ref):
    """One (batch, T-tile) block.

    x_ref:     (1, D, tile_t)  channel-major activation slab from [B, C, T]
    e_ref:     (K, D)          codebook (grid-constant)
    esq_ref:   (K, 1)          precomputed ||e_k||^2 (grid-constant)
    q_ref:     (1, D, tile_t)  quantized slab written straight into [B, C, T]
    idx_ref:   (1, 1, tile_t)  code indices (lane-dense)
    stats_ref: (1, 1, 128)     lane0=sum(min_rel) lane1=sum((q-x)^2)
                               lane2=sum(x)       lane3=sum(x^2)
    """
    x = x_ref[0].astype(jnp.float32)                      # (D, tn)
    D = x.shape[0]
    K = e_ref.shape[0]
    tn = tile_t

    x_bf = x.astype(jnp.bfloat16)

    # Ragged last T-tile: lanes past T hold unspecified data (no wrapper pad);
    # they are masked out of the stats and clipped on the q / idx writeback.
    t0 = pl.program_id(1) * tile_t
    lane = lax.broadcasted_iota(jnp.int32, (1, tn), 1)
    valid = (lane + t0) < T                               # (1, tn)

    run_min = jnp.full((1, tn), jnp.inf, jnp.float32)
    run_idx = jnp.zeros((1, tn), jnp.int32)
    q_run = jnp.zeros((D, tn), jnp.float32)

    # Chunk the codebook axis so the (K, tile_t) intermediates stay bounded.
    c0 = 0
    while c0 < K:                                         # static Python unroll
        ck = min(k_chunk, K - c0)
        e_c = e_ref[pl.ds(c0, ck), :].astype(jnp.float32)     # (ck, D)
        s2_c = esq_ref[pl.ds(c0, ck), :].astype(jnp.float32)  # (ck, 1)

        # Code-major relative distances: ||e||^2 - 2 <x, e>.
        # (||x||^2 is constant per row -> dropped from the argmin.)
        sim = lax.dot_general(e_c.astype(jnp.bfloat16), x_bf,
                              (((1,), (0,)), ((), ())),
                              preferred_element_type=jnp.float32)   # (ck, tn)
        d = s2_c - 2.0 * sim

        min_c = jnp.min(d, axis=0, keepdims=True)             # (1, tn)
        iota_c = lax.broadcasted_iota(jnp.int32, (ck, tn), 0) + c0
        # first index of the minimum inside the chunk (torch.min tie-break)
        idx_c = jnp.min(jnp.where(d <= min_c, iota_c, K), axis=0, keepdims=True)

        # Near-exact codebook gather: e = e_hi + e_lo (hi/lo bf16 split), two
        # bf16 MXU passes with a one-hot RHS, f32 accumulate -> |err| <~ 1e-5.
        onehot = (iota_c == idx_c).astype(jnp.bfloat16)        # (ck, tn)
        e_hi = e_c.astype(jnp.bfloat16)
        e_lo = (e_c - e_hi.astype(jnp.float32)).astype(jnp.bfloat16)
        q_c = (lax.dot_general(e_hi, onehot, (((0,), (0,)), ((), ())),
                               preferred_element_type=jnp.float32)
               + lax.dot_general(e_lo, onehot, (((0,), (0,)), ((), ())),
                                 preferred_element_type=jnp.float32))   # (D, tn)

        better = min_c < run_min        # strict '<': earlier chunk wins ties
        q_run = jnp.where(better, q_c, q_run)
        run_idx = jnp.where(better, idx_c, run_idx)
        run_min = jnp.where(better, min_c, run_min)
        c0 += ck

    q_ref[...] = q_run[None].astype(q_ref.dtype)
    idx_ref[...] = run_idx.reshape(1, 1, tn)

    # Per-tile partial sums (reduced in the wrapper -> both grid axes parallel).
    minrel_part = jnp.sum(jnp.where(valid, jnp.nan_to_num(run_min), 0.0))
    commit_part = jnp.sum(jnp.where(valid, (q_run - x) ** 2, 0.0))
    sumx_part = jnp.sum(jnp.where(valid, x, 0.0))
    sumx2_part = jnp.sum(jnp.where(valid, x * x, 0.0))

    lane128 = lax.broadcasted_iota(jnp.int32, (1, 128), 1)
    stats = (jnp.where(lane128 == 0, minrel_part, 0.0)
             + jnp.where(lane128 == 1, commit_part, 0.0)
             + jnp.where(lane128 == 2, sumx_part, 0.0)
             + jnp.where(lane128 == 3, sumx2_part, 0.0))
    stats_ref[...] = stats.reshape(1, 1, 128)


def vq_quantize_bct(x, embeddings, *, tile_t=512, k_chunk=512):
    """Quantize x: [B, C, T] against codebook (K, C); transposes fused in-kernel.

    Returns (quantized [B, C, T] f32,
             indices [B*T] i32 (batch-major, time-minor, matching torch flatten),
             sum(min_rel), sum((q-x)^2), sum(x), sum(x^2)).
    """
    B, C, T = x.shape
    K, D = embeddings.shape
    assert C == D, f"channel dim {C} must equal emb_dim {D}"

    # tile_t: full T when small, else a multiple of 128 (lane-dense); sweepable.
    tile_t = T if T <= tile_t else tile_t
    num_tt = -(-T // tile_t)
    nblk = B * num_tt

    x32 = x.astype(jnp.float32)
    e32 = embeddings.astype(jnp.float32)
    e_sq = jnp.sum(e32 * e32, axis=1, keepdims=True)          # (K, 1), hoisted

    kernel = functools.partial(_vq_kernel, T, tile_t, k_chunk)

    cost = pl.CostEstimate(
        flops=2 * 3 * B * T * K * D,                 # sim + 2-pass gather
        transcendentals=0,
        bytes_accessed=(2 * B * C * T * 4 + K * D * 4 + K * 4
                        + nblk * tile_t * 4 + nblk * 128 * 4))

    # Explicit scoped-VMEM budget (defaults are 16 MiB v5e / 32 MiB v6e, v7x).
    ck = min(k_chunk, K)
    vmem_need = 4 * (2 * 2 * D * tile_t              # x + q double buffers
                     + 2 * (K * D + K)               # codebook + norms
                     + 6 * ck * tile_t               # sim/d/onehot intermediates
                     + 4 * D * tile_t + 1024)
    vmem_limit = int(min(max(2 * vmem_need, 32 * 1024 * 1024), 64 * 1024 * 1024))

    q, idx, stats = pl.pallas_call(
        kernel,
        out_shape=(
            jax.ShapeDtypeStruct((B, C, T), jnp.float32),
            jax.ShapeDtypeStruct((nblk, 1, tile_t), jnp.int32),
            jax.ShapeDtypeStruct((nblk, 1, 128), jnp.float32),
        ),
        grid_spec=pltpu.PrefetchScalarGridSpec(
            num_scalar_prefetch=0,
            grid=(B, num_tt),
            in_specs=[
                pl.BlockSpec((1, C, tile_t), lambda b, t: (b, 0, t)),
                pl.BlockSpec((K, D), lambda b, t: (0, 0)),
                pl.BlockSpec((K, 1), lambda b, t: (0, 0)),
            ],
            out_specs=[
                pl.BlockSpec((1, C, tile_t), lambda b, t: (b, 0, t)),
                pl.BlockSpec((1, 1, tile_t), lambda b, t: (b * num_tt + t, 0, 0)),
                pl.BlockSpec((1, 1, 128), lambda b, t: (b * num_tt + t, 0, 0)),
            ],
        ),
        compiler_params=pltpu.CompilerParams(
            dimension_semantics=("parallel", "parallel"),
            vmem_limit_bytes=vmem_limit),
        cost_estimate=cost,
    )(x32, e32, e_sq)

    indices = idx.reshape(B, num_tt * tile_t)[:, :T].reshape(-1)
    stats2d = stats.reshape(nblk, 128)
    min_rel_sum = jnp.sum(stats2d[:, 0])
    commit_sum = jnp.sum(stats2d[:, 1])
    sum_x = jnp.sum(stats2d[:, 2])
    sum_x2 = jnp.sum(stats2d[:, 3])
    return q, indices, min_rel_sum, commit_sum, sum_x, sum_x2


def vq_level_forward(x, embeddings, beta, ema_update=True, training=False,
                     tile_t=512, k_chunk=512):
    """Single VectorQuantizer._forward. x: [B, C, T], C == emb_dim."""
    B, C, T = x.shape
    quantized, indices, min_rel_sum, commit_sum, sum_x, sum_x2 = vq_quantize_bct(
        x, embeddings, tile_t=tile_t, k_chunk=k_chunk)

    N = B * T
    M = N * C
    # fit = mean over rows of (||x||^2 + min_k(||e_k||^2 - 2 x.e_k))
    fit = (sum_x2 + min_rel_sum) / N
    # prenorm = ||x - mean(x)|| / sqrt(numel), fused from kernel stats
    mean_x = sum_x / M
    prenorm = jnp.sqrt(jnp.maximum(sum_x2 / M - mean_x * mean_x, 0.0))

    commit_loss = beta * commit_sum / M
    codebook_loss = 0.0 if ema_update else commit_sum / M
    loss = commit_loss + codebook_loss

    if training:
        out = x + lax.stop_gradient(quantized - x)   # straight-through estimator
    else:
        out = quantized                              # eval: identical values, no extra pass

    metrics = dict(fit=fit, prenorm=prenorm, indices=indices)
    return out, quantized, loss, metrics


class VQMultiPallas:
    """Pallas/JAX equivalent of VQMulti (eval-mode forward)."""

    def __init__(self, n_embs, emb_dims, betas, levels, key):
        self.levels = levels
        self.emb_dims = emb_dims
        self.n_embs = n_embs
        self.betas = betas
        self.embeddings = []
        for lvl in range(levels):
            key, sub = jax.random.split(key)
            # deterministic uniform init (mirrors the non-tiled init_codebook path)
            emb = jax.random.uniform(sub, (n_embs[lvl], emb_dims[lvl]),
                                     dtype=jnp.float32, minval=0.0, maxval=1.0)
            self.embeddings.append(emb)
        self.training = False

    def __call__(self, xs):
        zs, xs_quantised, commit_losses, metrics = [], [], [], []
        for lvl in range(self.levels):
            z, x_q, loss, metric = vq_level_forward(
                xs[lvl], self.embeddings[lvl], self.betas[lvl],
                ema_update=True, training=self.training)
            zs.append(z)
            if not self.training:
                x_q = lax.stop_gradient(x_q)
            xs_quantised.append(x_q)
            commit_losses.append(loss)
            if self.training:
                metrics.append(metric)
        return zs, xs_quantised, commit_losses, metrics

    def decode(self, zs, start_level=0, end_level=None):
        # sample_decoder: plain embedding lookup (no kernel needed)
        if end_level is None:
            end_level = self.levels
        return [self.embeddings[start_level + i][z] for i, z in enumerate(zs)]


if __name__ == "__main__":
    key = jax.random.PRNGKey(0)

    levels = 2
    n_embs = [64, 32]
    emb_dims = [32, 16]
    betas = [0.25, 0.25]
    B, T = 2, 8     # per-level inputs: [B, emb_dim, T]

    key, k_mod, k0, k1 = jax.random.split(key, 4)
    vq = VQMultiPallas(n_embs, emb_dims, betas, levels, k_mod)

    xs = [
        jax.random.normal(k0, (B, emb_dims[0], T), dtype=jnp.float32),
        jax.random.normal(k1, (B, emb_dims[1], T), dtype=jnp.float32),
    ]

    zs, xs_q, commit_losses, metrics = vq(xs)
    jax.block_until_ready((zs, xs_q, commit_losses))

    # --- correctness checks (tolerant to bf16 similarity-matmul rounding on near-ties)
    for lvl in range(levels):
        D = emb_dims[lvl]
        E = vq.embeddings[lvl]
        x = xs[lvl]
        out, q, loss, metric = vq_level_forward(x, E, betas[lvl],
                                                ema_update=True, training=False)
        jax.block_until_ready((out, q, loss))

        flat = jnp.transpose(x, (0, 2, 1)).reshape(-1, D)
        sim_hi = jnp.einsum('nd,kd->nk', flat, E, precision=lax.Precision.HIGHEST)
        d_ref = (jnp.sum(flat ** 2, 1, keepdims=True)
                 + jnp.sum(E ** 2, 1)[None, :] - 2.0 * sim_hi)
        idx = metric["indices"]
        n_rows = flat.shape[0]
        assert idx.shape == (n_rows,) and idx.dtype == jnp.int32, f"idx shape/dtype L{lvl}"

        # 1. quantized rows are (near-)exact codebook lookups of the chosen codes
        q_rows = jnp.transpose(q, (0, 2, 1)).reshape(-1, D)
        assert jnp.allclose(q_rows, E[idx], atol=1e-4), f"gather mismatch L{lvl}"

        # 2. chosen codes are optimal up to the bf16 similarity rounding bound
        dot_abs = jnp.abs(flat) @ jnp.abs(E).T
        slack = jnp.max(dot_abs, axis=1) * (2.0 ** -5) + 1e-3
        d_sel = d_ref[jnp.arange(n_rows), idx]
        d_min = jnp.min(d_ref, axis=1)
        assert bool(jnp.all(d_sel <= d_min + slack)), f"argmin outside tolerance L{lvl}"

        # 3. commit loss consistent with the returned quantized tensor
        ref_commit = betas[lvl] * jnp.mean((q - x) ** 2)
        assert jnp.allclose(ref_commit, loss, rtol=1e-4, atol=1e-6), f"loss mismatch L{lvl}"
        assert jnp.allclose(loss, commit_losses[lvl], rtol=1e-5, atol=1e-7), f"class loss L{lvl}"

        # 4. fused fit / prenorm metrics
        fit_ref = jnp.mean(d_sel)
        assert jnp.allclose(metric["fit"], fit_ref, rtol=5e-2, atol=1e-1), f"fit mismatch L{lvl}"
        prenorm_ref = jnp.linalg.norm(flat - jnp.mean(flat)) / np.sqrt(float(flat.size))
        assert jnp.allclose(metric["prenorm"], prenorm_ref, rtol=1e-3, atol=1e-5), \
            f"prenorm mismatch L{lvl}"

        # 5. eval-mode straight-through output aliases quantized values
        assert jnp.allclose(out, q), f"STE mismatch L{lvl}"
        assert jnp.allclose(zs[lvl], xs_q[lvl]), f"STE mismatch (class) L{lvl}"

    print("KERNEL_OK")
</pallas_src>

<mosaic_0001>
module attributes {stable_mosaic.version = 11 : i64} {
  func.func @_vq_kernel(%arg0: i32, %arg1: i32, %arg2: memref<1x32x8xf32, #tpu.memory_space<vmem>>, %arg3: memref<64x32xf32, #tpu.memory_space<vmem>>, %arg4: memref<64x1xf32, #tpu.memory_space<vmem>>, %arg5: memref<1x32x8xf32, #tpu.memory_space<vmem>>, %arg6: memref<1x1x8xi32, #tpu.memory_space<vmem>>, %arg7: memref<1x1x128xf32, #tpu.memory_space<vmem>>) attributes {dimension_semantics = [#tpu.dimension_semantics<parallel>, #tpu.dimension_semantics<parallel>], iteration_bounds = array<i64: 2, 1>, scalar_prefetch = 0 : i64, scratch_operands = 0 : i64, tpu.core_type = #tpu.core_type<tc>, window_params = [{transform_indices = @transform_0, window_bounds = array<i64: 1, 32, 8>}, {pipeline_mode = #tpu.pipeline_mode<synchronous>, transform_indices = @transform_1, window_bounds = array<i64: 64, 32>}, {pipeline_mode = #tpu.pipeline_mode<synchronous>, transform_indices = @transform_2, window_bounds = array<i64: 64, 1>}, {transform_indices = @transform_3, window_bounds = array<i64: 1, 32, 8>}, {transform_indices = @transform_4, window_bounds = array<i64: 1, 1, 8>}, {transform_indices = @transform_5, window_bounds = array<i64: 1, 1, 128>}]} {
    %c0 = arith.constant 0 : index
    %c0_0 = arith.constant 0 : index
    %c0_1 = arith.constant 0 : index
    %0 = vector.load %arg2[%c0, %c0_0, %c0_1] : memref<1x32x8xf32, #tpu.memory_space<vmem>>, vector<1x32x8xf32>
    %1 = vector.shape_cast %0 : vector<1x32x8xf32> to vector<32x8xf32>
    %2 = arith.truncf %1 : vector<32x8xf32> to vector<32x8xbf16>
    %c8_i32 = arith.constant 8 : i32
    %3 = arith.muli %arg1, %c8_i32 : i32
    %4 = tpu.iota {dimensions = array<i32: 1>} : vector<1x8xi32>
    %5 = vector.broadcast %3 : i32 to vector<1x8xi32>
    %6 = arith.addi %4, %5 : vector<1x8xi32>
    %c8_i32_2 = arith.constant 8 : i32
    %7 = vector.broadcast %c8_i32_2 : i32 to vector<1x8xi32>
    %8 = arith.cmpi slt, %6, %7 : vector<1x8xi32>
    %cst = arith.constant 0x7F800000 : f32
    %9 = vector.broadcast %cst : f32 to vector<1x8xf32>
    %c0_i32 = arith.constant 0 : i32
    %10 = vector.broadcast %c0_i32 : i32 to vector<1x8xi32>
    %cst_3 = arith.constant 0.000000e+00 : f32
    %11 = vector.broadcast %cst_3 : f32 to vector<32x8xf32>
    %c0_4 = arith.constant 0 : index
    %c0_5 = arith.constant 0 : index
    %12 = vector.load %arg3[%c0_4, %c0_5] : memref<64x32xf32, #tpu.memory_space<vmem>>, vector<64x32xf32>
    %c0_6 = arith.constant 0 : index
    %c0_7 = arith.constant 0 : index
    %13 = vector.load %arg4[%c0_6, %c0_7] : memref<64x1xf32, #tpu.memory_space<vmem>>, vector<64x1xf32>
    %14 = arith.truncf %12 : vector<64x32xf32> to vector<64x32xbf16>
    %cst_8 = arith.constant dense<0.000000e+00> : vector<64x8xf32>
    %15 = tpu.matmul %14, %2, %cst_8 {dimension_numbers = #tpu.dot_dimension_numbers<[1], [0], [0], [1], [0, 0, 1, 1], [], []>} : vector<64x32xbf16>, vector<32x8xbf16>, vector<64x8xf32> -> vector<64x8xf32>
    %cst_9 = arith.constant 2.000000e+00 : f32
    %16 = vector.broadcast %cst_9 : f32 to vector<64x8xf32>
    %17 = arith.mulf %16, %15 : vector<64x8xf32>
    %18 = vector.broadcast %13 : vector<64x1xf32> to vector<64x8xf32>
    %19 = arith.subf %18, %17 : vector<64x8xf32>
    %cst_10 = arith.constant dense<0x7F800000> : vector<8xf32>
    %20 = vector.multi_reduction <minimumf>, %19, %cst_10 [0] : vector<64x8xf32> to vector<8xf32>
    %21 = vector.shape_cast %20 : vector<8xf32> to vector<1x8xf32>
    %22 = tpu.iota {dimensions = array<i32: 0>} : vector<64x8xi32>
    %c0_i32_11 = arith.constant 0 : i32
    %23 = vector.broadcast %c0_i32_11 : i32 to vector<64x8xi32>
    %24 = arith.addi %22, %23 : vector<64x8xi32>
    %25 = vector.broadcast %21 : vector<1x8xf32> to vector<64x8xf32>
    %26 = arith.cmpf ole, %19, %25 : vector<64x8xf32>
    %c64_i32 = arith.constant 64 : i32
    %27 = vector.broadcast %c64_i32 : i32 to vector<64x8xi32>
    %28 = arith.select %26, %24, %27 : vector<64x8xi1>, vector<64x8xi32>
    %cst_12 = arith.constant dense<2147483647> : vector<8xi32>
    %29 = vector.multi_reduction <minsi>, %28, %cst_12 [0] : vector<64x8xi32> to vector<8xi32>
    %30 = vector.shape_cast %29 : vector<8xi32> to vector<1x8xi32>
    %31 = vector.broadcast %30 : vector<1x8xi32> to vector<64x8xi32>
    %32 = arith.cmpi eq, %24, %31 : vector<64x8xi32>
    %33 = arith.extui %32 : vector<64x8xi1> to vector<64x8xi32>
    %34 = arith.sitofp %33 : vector<64x8xi32> to vector<64x8xf32>
    %35 = arith.truncf %34 : vector<64x8xf32> to vector<64x8xbf16>
    %36 = arith.truncf %12 : vector<64x32xf32> to vector<64x32xbf16>
    %37 = arith.extf %36 : vector<64x32xbf16> to vector<64x32xf32>
    %38 = arith.subf %12, %37 : vector<64x32xf32>
    %39 = arith.truncf %38 : vector<64x32xf32> to vector<64x32xbf16>
    %cst_13 = arith.constant dense<0.000000e+00> : vector<32x8xf32>
    %40 = tpu.matmul %36, %35, %cst_13 {dimension_numbers = #tpu.dot_dimension_numbers<[0], [0], [1], [1], [0, 1, 1, 1], [], []>} : vector<64x32xbf16>, vector<64x8xbf16>, vector<32x8xf32> -> vector<32x8xf32>
    %cst_14 = arith.constant dense<0.000000e+00> : vector<32x8xf32>
    %41 = tpu.matmul %39, %35, %cst_14 {dimension_numbers = #tpu.dot_dimension_numbers<[0], [0], [1], [1], [0, 1, 1, 1], [], []>} : vector<64x32xbf16>, vector<64x8xbf16>, vector<32x8xf32> -> vector<32x8xf32>
    %42 = arith.addf %40, %41 : vector<32x8xf32>
    %43 = arith.cmpf olt, %21, %9 : vector<1x8xf32>
    %44 = vector.shape_cast %43 : vector<1x8xi1> to vector<1x8xi1>
    %45 = vector.broadcast %44 : vector<1x8xi1> to vector<32x8xi1>
    %46 = arith.select %45, %42, %11 : vector<32x8xi1>, vector<32x8xf32>
    %47 = arith.select %43, %30, %10 : vector<1x8xi1>, vector<1x8xi32>
    %48 = arith.select %43, %21, %9 : vector<1x8xi1>, vector<1x8xf32>
    %49 = vector.shape_cast %46 : vector<32x8xf32> to vector<1x32x8xf32>
    %c0_15 = arith.constant 0 : index
    %c0_16 = arith.constant 0 : index
    %c0_17 = arith.constant 0 : index
    %50 = vector.load %arg5[%c0_15, %c0_16, %c0_17] : memref<1x32x8xf32, #tpu.memory_space<vmem>>, vector<1x32x8xf32>
    tpu.vector_store %arg5[%c0_15, %c0_16, %c0_17], %49 {strides = array<i32>} : memref<1x32x8xf32, #tpu.memory_space<vmem>>, vector<1x32x8xf32>,
    %51 = vector.shape_cast %47 : vector<1x8xi32> to vector<1x1x8xi32>
    %c0_18 = arith.constant 0 : index
    %c0_19 = arith.constant 0 : index
    %c0_20 = arith.constant 0 : index
    %52 = vector.load %arg6[%c0_18, %c0_19, %c0_20] : memref<1x1x8xi32, #tpu.memory_space<vmem>>, vector<1x1x8xi32>
    tpu.vector_store %arg6[%c0_18, %c0_19, %c0_20], %51 {strides = array<i32>} : memref<1x1x8xi32, #tpu.memory_space<vmem>>, vector<1x1x8xi32>,
    %53 = arith.cmpf one, %48, %48 : vector<1x8xf32>
    %cst_21 = arith.constant 0.000000e+00 : f32
    %54 = vector.broadcast %cst_21 : f32 to vector<1x8xf32>
    %55 = arith.select %53, %54, %48 : vector<1x8xi1>, vector<1x8xf32>
    %cst_22 = arith.constant 0x7F800000 : f32
    %56 = vector.broadcast %cst_22 : f32 to vector<1x8xf32>
    %57 = arith.cmpf oeq, %55, %56 : vector<1x8xf32>
    %cst_23 = arith.constant 3.40282347E+38 : f32
    %58 = vector.broadcast %cst_23 : f32 to vector<1x8xf32>
    %59 = arith.select %57, %58, %55 : vector<1x8xi1>, vector<1x8xf32>
    %cst_24 = arith.constant 0xFF800000 : f32
    %60 = vector.broadcast %cst_24 : f32 to vector<1x8xf32>
    %61 = arith.cmpf oeq, %59, %60 : vector<1x8xf32>
    %cst_25 = arith.constant -3.40282347E+38 : f32
    %62 = vector.broadcast %cst_25 : f32 to vector<1x8xf32>
    %63 = arith.select %61, %62, %59 : vector<1x8xi1>, vector<1x8xf32>
    %cst_26 = arith.constant 0.000000e+00 : f32
    %64 = vector.broadcast %cst_26 : f32 to vector<1x8xf32>
    %65 = arith.select %8, %63, %64 : vector<1x8xi1>, vector<1x8xf32>
    %66 = vector.shape_cast %65 : vector<1x8xf32> to vector<1x1x8xf32>
    %cst_27 = arith.constant dense<0.000000e+00> : vector<1xf32>
    %67 = vector.multi_reduction <add>, %66, %cst_27 [1, 2] : vector<1x1x8xf32> to vector<1xf32>
    %68 = vector.shape_cast %67 : vector<1xf32> to vector<1x1x1xf32>
    %69 = vector.extract %68[0, 0, 0] : f32 from vector<1x1x1xf32>
    %70 = arith.subf %46, %1 : vector<32x8xf32>
    %71 = arith.mulf %70, %70 : vector<32x8xf32>
    %cst_28 = arith.constant 0.000000e+00 : f32
    %72 = vector.shape_cast %8 : vector<1x8xi1> to vector<1x8xi1>
    %73 = vector.broadcast %72 : vector<1x8xi1> to vector<32x8xi1>
    %74 = vector.broadcast %cst_28 : f32 to vector<32x8xf32>
    %75 = arith.select %73, %71, %74 : vector<32x8xi1>, vector<32x8xf32>
    %76 = vector.shape_cast %75 : vector<32x8xf32> to vector<1x32x8xf32>
    %cst_29 = arith.constant dense<0.000000e+00> : vector<1xf32>
    %77 = vector.multi_reduction <add>, %76, %cst_29 [1, 2] : vector<1x32x8xf32> to vector<1xf32>
    %78 = vector.shape_cast %77 : vector<1xf32> to vector<1x1x1xf32>
    %79 = vector.extract %78[0, 0, 0] : f32 from vector<1x1x1xf32>
    %cst_30 = arith.constant 0.000000e+00 : f32
    %80 = vector.shape_cast %8 : vector<1x8xi1> to vector<1x8xi1>
    %81 = vector.broadcast %80 : vector<1x8xi1> to vector<32x8xi1>
    %82 = vector.broadcast %cst_30 : f32 to vector<32x8xf32>
    %83 = arith.select %81, %1, %82 : vector<32x8xi1>, vector<32x8xf32>
    %84 = vector.shape_cast %83 : vector<32x8xf32> to vector<1x32x8xf32>
    %cst_31 = arith.constant dense<0.000000e+00> : vector<1xf32>
    %85 = vector.multi_reduction <add>, %84, %cst_31 [1, 2] : vector<1x32x8xf32> to vector<1xf32>
    %86 = vector.shape_cast %85 : vector<1xf32> to vector<1x1x1xf32>
    %87 = vector.extract %86[0, 0, 0] : f32 from vector<1x1x1xf32>
    %88 = arith.mulf %1, %1 : vector<32x8xf32>
    %cst_32 = arith.constant 0.000000e+00 : f32
    %89 = vector.shape_cast %8 : vector<1x8xi1> to vector<1x8xi1>
    %90 = vector.broadcast %89 : vector<1x8xi1> to vector<32x8xi1>
    %91 = vector.broadcast %cst_32 : f32 to vector<32x8xf32>
    %92 = arith.select %90, %88, %91 : vector<32x8xi1>, vector<32x8xf32>
    %93 = vector.shape_cast %92 : vector<32x8xf32> to vector<1x32x8xf32>
    %cst_33 = arith.constant dense<0.000000e+00> : vector<1xf32>
    %94 = vector.multi_reduction <add>, %93, %cst_33 [1, 2] : vector<1x32x8xf32> to vector<1xf32>
    %95 = vector.shape_cast %94 : vector<1xf32> to vector<1x1x1xf32>
    %96 = vector.extract %95[0, 0, 0] : f32 from vector<1x1x1xf32>
    %97 = tpu.iota {dimensions = array<i32: 1>} : vector<1x128xi32>
    %c0_i32_34 = arith.constant 0 : i32
    %98 = vector.broadcast %c0_i32_34 : i32 to vector<1x128xi32>
    %99 = arith.cmpi eq, %97, %98 : vector<1x128xi32>
    %cst_35 = arith.constant 0.000000e+00 : f32
    %100 = vector.broadcast %69 : f32 to vector<1x128xf32>
    %101 = vector.broadcast %cst_35 : f32 to vector<1x128xf32>
    %102 = arith.select %99, %100, %101 : vector<1x128xi1>, vector<1x128xf32>
    %c1_i32 = arith.constant 1 : i32
    %103 = vector.broadcast %c1_i32 : i32 to vector<1x128xi32>
    %104 = arith.cmpi eq, %97, %103 : vector<1x128xi32>
    %cst_36 = arith.constant 0.000000e+00 : f32
    %105 = vector.broadcast %79 : f32 to vector<1x128xf32>
    %106 = vector.broadcast %cst_36 : f32 to vector<1x128xf32>
    %107 = arith.select %104, %105, %106 : vector<1x128xi1>, vector<1x128xf32>
    %108 = arith.addf %102, %107 : vector<1x128xf32>
    %c2_i32 = arith.constant 2 : i32
    %109 = vector.broadcast %c2_i32 : i32 to vector<1x128xi32>
    %110 = arith.cmpi eq, %97, %109 : vector<1x128xi32>
    %cst_37 = arith.constant 0.000000e+00 : f32
    %111 = vector.broadcast %87 : f32 to vector<1x128xf32>
    %112 = vector.broadcast %cst_37 : f32 to vector<1x128xf32>
    %113 = arith.select %110, %111, %112 : vector<1x128xi1>, vector<1x128xf32>
    %114 = arith.addf %108, %113 : vector<1x128xf32>
    %c3_i32 = arith.constant 3 : i32
    %115 = vector.broadcast %c3_i32 : i32 to vector<1x128xi32>
    %116 = arith.cmpi eq, %97, %115 : vector<1x128xi32>
    %cst_38 = arith.constant 0.000000e+00 : f32
    %117 = vector.broadcast %96 : f32 to vector<1x128xf32>
    %118 = vector.broadcast %cst_38 : f32 to vector<1x128xf32>
    %119 = arith.select %116, %117, %118 : vector<1x128xi1>, vector<1x128xf32>
    %120 = arith.addf %114, %119 : vector<1x128xf32>
    %121 = vector.shape_cast %120 : vector<1x128xf32> to vector<1x1x128xf32>
    %c0_39 = arith.constant 0 : index
    %c0_40 = arith.constant 0 : index
    %c0_41 = arith.constant 0 : index
    %122 = vector.load %arg7[%c0_39, %c0_40, %c0_41] : memref<1x1x128xf32, #tpu.memory_space<vmem>>, vector<1x1x128xf32>
    tpu.vector_store %arg7[%c0_39, %c0_40, %c0_41], %121 {strides = array<i32>} : memref<1x1x128xf32, #tpu.memory_space<vmem>>, vector<1x1x128xf32>,
    return
  }
  func.func @transform_0(%arg0: i32, %arg1: i32) -> (i32, i32, i32) {
    %c0_i32 = arith.constant 0 : i32
    %c0_i32_0 = arith.constant 0 : i32
    return %arg0, %c0_i32, %arg1 : i32, i32, i32
  }
  func.func @transform_1(%arg0: i32, %arg1: i32) -> (i32, i32) {
    %c0_i32 = arith.constant 0 : i32
    %c0_i32_0 = arith.constant 0 : i32
    %c0_i32_1 = arith.constant 0 : i32
    return %c0_i32, %c0_i32_0 : i32, i32
  }
  func.func @transform_2(%arg0: i32, %arg1: i32) -> (i32, i32) {
    %c0_i32 = arith.constant 0 : i32
    %c0_i32_0 = arith.constant 0 : i32
    %c0_i32_1 = arith.constant 0 : i32
    return %c0_i32, %c0_i32_0 : i32, i32
  }
  func.func @transform_3(%arg0: i32, %arg1: i32) -> (i32, i32, i32) {
    %c0_i32 = arith.constant 0 : i32
    %c0_i32_0 = arith.constant 0 : i32
    return %arg0, %c0_i32, %arg1 : i32, i32, i32
  }
  func.func @transform_4(%arg0: i32, %arg1: i32) -> (i32, i32, i32) {
    %c1_i32 = arith.constant 1 : i32
    %0 = arith.muli %arg0, %c1_i32 : i32
    %1 = arith.addi %0, %arg1 : i32
    %c0_i32 = arith.constant 0 : i32
    %c0_i32_0 = arith.constant 0 : i32
    %c0_i32_1 = arith.constant 0 : i32
    return %1, %c0_i32, %c0_i32_0 : i32, i32, i32
  }
  func.func @transform_5(%arg0: i32, %arg1: i32) -> (i32, i32, i32) {
    %c1_i32 = arith.constant 1 : i32
    %0 = arith.muli %arg0, %c1_i32 : i32
    %1 = arith.addi %0, %arg1 : i32
    %c0_i32 = arith.constant 0 : i32
    %c0_i32_0 = arith.constant 0 : i32
    %c0_i32_1 = arith.constant 0 : i32
    return %1, %c0_i32, %c0_i32_0 : i32, i32, i32
  }
}

</mosaic_0001>

<bundles_post_ra>
// kernel: tpu_custom_call.1
= control target key start
LH: loop header
LB: loop body
LE: loop exit
PB: predicated region body
PF: predicated region fallthrough
CT: control target
= control target key end

     0   :  { %11 = vsyncpa [#allocation3], 0  ;;  %s1582_s0 = inlined_call_operand.vmem [shape: f32[2,32,8], index: 0, kind: input, shape index: {}]   ;;  %s1583_s1 = inlined_call_operand.vmem [shape: f32[64,32], index: 1, kind: input, shape index: {}]   ;;  %s1584_s2 = inlined_call_operand.vmem [shape: f32[64,1], index: 2, kind: input, shape index: {}]   ;;  %s1585_s3 = inlined_call_operand.vmem [shape: f32[2,32,8], index: 3, kind: output, shape index: {0}]   ;;  %s1586_s4 = inlined_call_operand.hbm [shape: s32[2,1,8], index: 4, kind: output, shape index: {1}]   ;;  %s1587_s5 = inlined_call_operand.hbm [shape: f32[2,1,128], index: 5, kind: output, shape index: {2}]  }
   0x1   :  { %13 = vsyncpa [#allocation3 + $0x1], 0 }
   0x2   :  { %14 = vsyncpa [#allocation5], 0 }
   0x3   :  { %16 = vsyncpa [#allocation5 + $0x1], 0  ;;  %s1221_s18 = smov 0   ;;  %s1223_s19 = smov 0  }
   0x4   :  { %s1225_s20 = smov 0   ;;  %s1227_s21 = smov 0  }
   0x5   :  { %s1229_s22 = smov 0   ;;  %s1231_s23 = smov 0  }
   0x6 LB: > { %s949_s24 = sadd.s32 4294967295, %s1187_s23   ;;  %s950_s25 = sadd.s32 4294967294, %s1187_s23   ;;  %s1187_s23 = sphi %s1231_s23, %s22_s23   ;;  %s1183_s22 = sphi %s1229_s22, %s1594_s22   ;;  %s1179_s21 = sphi %s1227_s21, %s1593_s21   ;;  %s1175_s20 = sphi %s1225_s20, %s1592_s20   ;;  %s1171_s19 = sphi %s1223_s19, %s1591_s19   ;;  %s1167_s18 = sphi %s1221_s18, %s1590_s18  }
   0x7   : > { %s34_s26 = sadd.s32 1, %s1183_s22  ;;  %s141_s27 = sadd.s32 1, %s1175_s20 }
   0x8   : > { %p36_p0 = scmp.ge.s32.totalorder %s34_s26, 2  ;;  %p151_p1 = scmp.ne.s32.totalorder %s1175_s20, %s1171_s19 }
   0x9   : > { %p152_p2 = scmp.eq.s32.totalorder %s949_s24, 1  ;;  %p157_p3 = scmp.ne.s32.totalorder %s1171_s19, %s1167_s18 }
   0xa   : > { %s1596_s26 = smov (%p36_p0, %s34_s26), 0  ;;  %p158_p5 = scmp.eq.s32.totalorder %s950_s25, 1 }
   0xb   : > { %p1261_p4 = por %p152_p2, %p151_p1  ;;  %s138_s29 = ssub.s32 %s1183_s22, %s1596_s26 }
   0xc   : > { %p953_p6 = scmp.ge.s32.totalorder %s1187_s23, 1  ;;  %p139_p7 = scmp.eq.s32.totalorder %s138_s29, 0 }
   0xd   : > { %p1268_p8 = por %p158_p5, %p157_p3  ;;  %p221_p9 = scmp.lt.s32.totalorder %s1187_s23, 3 }
   0xe   : > { %s1274_s6 = scalar_select %p139_p7, %s1175_s20, %s141_s27  }
   0xf   : > { %p222_p10 = pnand %p953_p6, %p221_p9 }
  0x10   : > { %p263_p11 = scmp.lt.s32.totalorder (!%p222_p10), %s1179_s21, 1  ;;  %s1432_s17 = sand.u32 (!%p222_p10), 1, %s1171_s19  }
  0x11   : > { %225 = sbr.rel (%p222_p10) target bundleno = 637 (0x27d), region = 32  ;;  %s256_s24 = scalar_lea.vmem (!%p222_p10), [#allocation2], %s1432_s17 }
  0x12   : > { %s796_s8 = scalar_lea.hbm (!%p222_p10), %s1586_s4, %s1179_s21  ;;  %s798_s9 = sshll.u32 (!%p222_p10), %s256_s24, 4  ;;  %s799_s9 = int_to_ptr.vmem [resolvable:$true] %s798_s9 }
  0x13   : > { %s780_s11 = scalar_lea.sflag (!%p222_p10), [#allocation3], %s1432_s17  ;;  %s1097_s25 = scalar_lea.hbm (!%p222_p10), %s1586_s4, 2 }
  0x16   : > { %v306_v0 = vld [vmem:[%s1584_s2 + $0x20] sm:$0xff]  ;;  %v1283_v1 = vld [vmem:[%s1583_s1 + $0x10] sm:$0xff]  ;;  %v1288_v2 = vld [vmem:[%s1583_s1 + $0x18] sm:$0xff]  ;;  %v1189_v3 = vmov 0   ;;  %s1294_s15 = scalar_select %p263_p11, %s1179_s21, 1  ;;  %vm338_vm0 = vcmask 261120  }
  0x17   : > { %1068 = vset.pattern.permute.xlu2 %v1189_v3  ;;  %1067 = vset.pattern.permute.xlu1 %v1189_v3  ;;  %v304_v4 = vld [vmem:[%s1584_s2 + $0x10] sm:$0xff]  ;;  %v294_v5 = vld [vmem:[%s1583_s1] sm:$0xff]  ;;  %v295_v6 = vld [vmem:[%s1583_s1 + $0x8] sm:$0xff]  ;;  %v312_v8 = vpack.c.bf16 %v1283_v1, %v1283_v1  ;;  %v313_v9 = vpack.c.bf16 %v1288_v2, %v1288_v2  ;;  %vm436_vm1 = vcmask 64512   ;;  %vm662_vm2 = vcmask 57344  }
  0x18   : > { %410 = vperm.xlu2 %1068, %v306_v0   ;;  %400 = vperm.xlu1 %1067, %v304_v4   ;;  %v302_v7 = vld [vmem:[%s1584_s2] sm:$0xff]  ;;  %s992_s7 = sshll.u32 %s1294_s15, 5  ;;  %v310_v10 = vpack.c.bf16 %v294_v5, %v294_v5  ;;  %v311_v14 = vpack.c.bf16 %v295_v6, %v295_v6  ;;  %v307_v17 = vld [vmem:[%s1584_s2 + $0x28] sm:$0xff]  ;;  %v305_v18 = vld [vmem:[%s1584_s2 + $0x18] sm:$0xff] }
  0x19   : > { %1066 = vset.pattern.permute.xlu0 %v1189_v3  ;;  %s270_s10 = scalar_lea.vmem %s1582_s0, %s992_s7  ;;  %v328_v19 = vunpack.c.l.b16 %v312_v8  ;;  %v329_v20 = vunpack.c.l.b16 %v313_v9  ;;  %v303_v26 = vld [vmem:[%s1584_s2 + $0x8] sm:$0xff]  ;;  %v309_v27 = vld [vmem:[%s1584_s2 + $0x38] sm:$0xff]  ;;  %v298_v28 = vld [vmem:[%s1583_s1 + $0x20] sm:$0xff]  ;;  %v544_v48 = vunpack.c.l.bf16 %v312_v8  ;;  %v545_v49 = vunpack.c.l.bf16 %v313_v9  ;;  %s1468_s29 = scalar_lea.vmem %s1585_s3, %s992_s7 }
  0x1a   : > { %390 = vperm.xlu0 %1066, %v302_v7   ;;  %v1315_v11 = vld [vmem:[%s270_s10 + $0x10] sm:$0xff]  ;;  %v1317_v12 = vld [vmem:[%s270_s10 + $0x18] sm:$0xff]  ;;  %v1319_v13 = vld [vmem:[%s270_s10] sm:$0xff]  ;;  %v326_v21 = vunpack.c.l.b16 %v310_v10  ;;  %v327_v22 = vunpack.c.l.b16 %v311_v14  ;;  %v314_v30 = vpack.c.bf16 %v298_v28, %v298_v28  ;;  %v542_v40 = vunpack.c.l.bf16 %v310_v10 }
  0x1b   : > { %v287_v15 = vpack.c.bf16 %v1317_v12, %v1315_v11  ;;  %v1323_v16 = vld [vmem:[%s270_s10 + $0x8] sm:$0xff]  ;;  %v335_v24 = vpack.c.b16 %v329_v20, %v328_v19  ;;  %v308_v32 = vld [vmem:[%s1584_s2 + $0x30] sm:$0xff]  ;;  %v301_v37 = vld [vmem:[%s1583_s1 + $0x38] sm:$0xff]  ;;  %v543_v41 = vunpack.c.l.bf16 %v311_v14  ;;  %v552_v50 = vsub.f32 %v1283_v1, %v544_v48  ;;  %s800_s10 = sshll.u32 %s796_s8, 4  ;;  %s801_s10 = int_to_ptr.hbm [resolvable:$true] %s800_s10 }
  0x1c   : > { %v286_v23 = vpack.c.bf16 %v1323_v16, %v1319_v13  ;;  %v334_v25 = vpack.c.b16 %v327_v22, %v326_v21  ;;  %v299_v29 = vld [vmem:[%s1583_s1 + $0x28] sm:$0xff]  ;;  %v330_v33 = vunpack.c.l.b16 %v314_v30  ;;  %v300_v36 = vld [vmem:[%s1583_s1 + $0x30] sm:$0xff]  ;;  %v317_v39 = vpack.c.bf16 %v301_v37, %v301_v37  ;;  %s1091_s12 = sshra.s32 %s801_s10, 4  ;;  %s1092_s12 = int_to_ptr.hbm [resolvable:$true] %s1091_s12 }
  0x1d   : > { %994 = vmatpush.bf16.msra.mxu3 %v287_v15  ;;  %357 = vmatpush.bf16.msra.mxu0 %v287_v15  ;;  %v315_v31 = vpack.c.bf16 %v299_v29, %v299_v29  ;;  %v316_v38 = vpack.c.bf16 %v300_v36, %v300_v36  ;;  %v550_v44 = vsub.f32 %v294_v5, %v542_v40  ;;  %v546_v53 = vunpack.c.l.bf16 %v314_v30  ;;  %s1093_s13 = scalar_lea.hbm %s1092_s12, 1  ;;  %p1098_p1 = scmp.lt.s32.totalorder %s1092_s12, %s1586_s4 }
  0x1e   : > { %v333_v43 = vunpack.c.l.b16 %v317_v39  ;;  %v551_v45 = vsub.f32 %v295_v6, %v543_v41  ;;  %v553_v51 = vsub.f32 %v1288_v2, %v545_v49  ;;  %v549_v59 = vunpack.c.l.bf16 %v317_v39  ;;  %p1094_p12 = scmp.ne.s32.totalorder %s1092_s12, %s1093_s13  ;;  %p1099_p2 = scmp.lt.s32.totalorder %s1097_s25, %s1093_s13 }
  0x1f   : > { %v331_v34 = vunpack.c.l.b16 %v315_v31  ;;  %v332_v42 = vunpack.c.l.b16 %v316_v38  ;;  %v547_v54 = vunpack.c.l.bf16 %v315_v31  ;;  %v554_v55 = vsub.f32 %v298_v28, %v546_v53 }
  0x20   : > { %415 = vperm.xlu2 %1068, %v307_v17   ;;  %405 = vperm.xlu1 %1067, %v305_v18   ;;  %v558_v47 = vpack.c.bf16 %v551_v45, %v550_v44  ;;  %v559_v52 = vpack.c.bf16 %v553_v51, %v552_v50  ;;  %v548_v58 = vunpack.c.l.bf16 %v316_v38  ;;  %v557_v61 = vsub.f32 %v301_v37, %v549_v59  ;;  %p1095_p13 = pnand %p1094_p12, %p1261_p4  ;;  %p1100_p3 = por %p1099_p2, %p1098_p1 }
  0x21   : > { %995 = vmatpush.bf16.msra.mxu3 %v286_v23  ;;  %358 = vmatpush.bf16.msra.mxu0 %v286_v23  ;;  %v336_v35 = vpack.c.b16 %v331_v34, %v330_v33  ;;  %v337_v46 = vpack.c.b16 %v333_v43, %v332_v42  ;;  %v555_v56 = vsub.f32 %v299_v29, %v547_v54  ;;  %v289_v51 = vlaneseq }
  0x22   : > { %395 = vperm.xlu0 %1066, %v303_v26   ;;  %v556_v60 = vsub.f32 %v300_v36, %v548_v58  ;;  %p1096_p0 = pneg %p1095_p13 }
  0x23   : > { %v560_v57 = vpack.c.bf16 %v555_v56, %v554_v55  ;;  %v1371_v54 = vshrl.u32 %v289_v51, 7 }
  0x24   : > { %959 = vmatmul.msk.bf16.vlgmr.msra.gmra.mxu3 %vm338_vm0, %v335_v24  ;;  %958 = vmatmul.msk.bf16.vlgmr.msra.gmra.mxu0 %vm338_vm0, %v334_v25  ;;  %v561_v62 = vpack.c.bf16 %v557_v61, %v556_v60  ;;  %p1101_p5 = pnand %p1100_p3, %p1096_p0 }
  0x25   : > { %v1379_v59 = vadd.s32 16, %v1371_v54  ;;  %v1382_v60 = vadd.s32 24, %v1371_v54  ;;  %v1385_v61 = vadd.s32 32, %v1371_v54 }
  0x28   : > { %425 = vperm.xlu1 %1067, %v309_v27  }
  0x2a   : > { %420 = vperm.xlu0 %1066, %v308_v32  }
  0x34   : > { %960 = vmatmul.msk.bf16.gmra.mxu3 %vm338_vm0, %v336_v35 }
  0x44   : > { %961 = vmatmul.msk.bf16.gmra.mxu3 %vm338_vm0, %v337_v46 }
  0x46   : > { %1069 = vxpose.binary.xlu2.c.b16.start [1/8] (short) (narrow) %v558_v47, %v334_v25, 32 }
  0x56   : > { %1070 = vxpose.binary.xlu2.c.b16.cont [2/8] (short) (narrow) %v559_v52, %v335_v24, 32 }
  0x66   : > { %1071 = vxpose.binary.xlu2.c.b16.cont [3/8] (short) (narrow) %v560_v57, %v336_v35, 32  ;;  %v1374_v57 = vadd.s32 8, %v1371_v54 }
  0x72   : > { %v411_v6 = vpop.permute.xlu2 %410 }
  0x76   : > { %1072 = vxpose.binary.xlu2.c.b16.end [4/8] (short) (narrow) %v561_v62, %v337_v46, 32  ;;  %v1387_v62 = vand.u32 127, %v289_v51 }
  0x78   : > { %vm293_vm13 = vcmp.lt.s32.totalorder %v1387_v62, 8 }
  0x7a   : > { %v416_v20 = vpop.permute.xlu2 %415 }
  0x8a   : > { %v401_v2 = vpop.permute.xlu1 %400 }
  0x8c   : > { %v391_v1 = vpop.permute.xlu0 %390 }
  0x92   : > { %v406_v15 = vpop.permute.xlu1 %405 }
  0x94   : > { %v396_v7 = vpop.permute.xlu0 %395 }
  0x9a   : > { %v426_v35 = vpop.permute.xlu1 %425 }
  0x9c   : > { %v421_v25 = vpop.permute.xlu0 %420 }
  0xa1   : > { %v360_v4 = vpop.f32.mrf.mxu0 }
  0xa2   : > { %v380_v17 = vmul.f32 2.0, %v360_v4 }
  0xa4   : > { %v428_v26 = vsub.f32 %v391_v1, %v380_v17 }
  0xa6   : > { %v437_v36 = vsel %vm436_vm1, %v428_v26, inf }
  0xa7   : > { %v365_v63 = vpop.f32.mrf.mxu3 }
  0xa8   : > { %v382_v21 = vmul.f32 2.0, %v365_v63  ;;  %v1390_v63 = vadd.s32 40, %v1371_v54 }
  0xa9   : > { %v362_v8 = vpop.f32.mrf.mxu0 }
  0xaa   : > { %v381_v10 = vmul.f32 2.0, %v362_v8  ;;  %v430_v29 = vsub.f32 %v401_v2, %v382_v21 }
  0xac   : > { %v429_v23 = vsub.f32 %v396_v7, %v381_v10  ;;  %v439_v41 = vsel %vm436_vm1, %v430_v29, inf }
  0xae   : > { %v438_v32 = vsel %vm436_vm1, %v429_v23, inf }
  0xaf   : > { %v367_v0 = vpop.f32.mrf.mxu3 }
  0xb0   : > { %v383_v22 = vmul.f32 2.0, %v367_v0  ;;  %v1393_v0 = vadd.s32 48, %v1371_v54 }
  0xb2   : > { %v431_v31 = vsub.f32 %v406_v15, %v383_v22 }
  0xb4   : > { %v440_v42 = vsel %vm436_vm1, %v431_v31, inf }
  0xb7   : > { %v370_v3 = vpop.f32.mrf.mxu3 }
  0xb8   : > { %v384_v18 = vmul.f32 2.0, %v370_v3  ;;  %v1397_v3 = vadd.s32 56, %v1371_v54 }
  0xba   : > { %v432_v27 = vsub.f32 %v411_v6, %v384_v18 }
  0xbc   : > { %v441_v37 = vsel %vm436_vm1, %v432_v27, inf }
  0xbd   : > { %v442_v44 = vmin.f32 %v437_v36, %v441_v37 }
  0xbf   : > { %v372_v5 = vpop.f32.mrf.mxu3 }
  0xc0   : > { %v385_v14 = vmul.f32 2.0, %v372_v5 }
  0xc2   : > { %v1360_v24 = vsub.f32 %v416_v20, %v385_v14 }
  0xc4   : > { %v443_v33 = vsel %vm436_vm1, %v1360_v24, inf }
  0xc5   : > { %v444_v40 = vmin.f32 %v438_v32, %v443_v33 }
  0xc7   : > { %v375_v9 = vpop.f32.mrf.mxu3  ;;  %v449_v47 = vmin.f32 %v442_v44, %v444_v40 }
  0xc8   : > { %v386_v19 = vmul.f32 2.0, %v375_v9 }
  0xca   : > { %v434_v28 = vsub.f32 %v421_v25, %v386_v19 }
  0xcc   : > { %v445_v38 = vsel %vm436_vm1, %v434_v28, inf }
  0xcd   : > { %v446_v45 = vmin.f32 %v439_v41, %v445_v38 }
  0xcf   : > { %v377_v30 = vpop.f32.mrf.mxu3 }
  0xd0   : > { %v387_v34 = vmul.f32 2.0, %v377_v30 }
  0xd2   : > { %v435_v39 = vsub.f32 %v426_v35, %v387_v34 }
  0xd4   : > { %v447_v43 = vsel %vm436_vm1, %v435_v39, inf }
  0xd5   : > { %v448_v46 = vmin.f32 %v440_v42, %v447_v43  ;;  %v1190_v42 = vmov 1.0|1.0  }
  0xd7   : > { %v450_v48 = vmin.f32 %v446_v45, %v448_v46 }
  0xd9   : > { %v451_v49 = vmin.f32 %v449_v47, %v450_v48 }
  0xdb   : > { %v452_v50 = vrot.slane %v451_v49, 4 }
  0xdd   : > { %v453_v52 = vmin.f32 %v451_v49, %v452_v50 }
  0xdf   : > { %v454_v53 = vrot.slane %v453_v52, 2 }
  0xe1   : > { %v455_v55 = vmin.f32 %v453_v52, %v454_v53 }
  0xe3   : > { %v456_v56 = vrot.slane %v455_v55, 1 }
  0xe5   : > { %v1376_v58 = vmin.f32 %v455_v55, %v456_v56  ;;  %v711_v55 = vsel %vm293_vm13, %v1319_v13, 0.0  ;;  %v712_v56 = vsel %vm293_vm13, %v1323_v16, 0.0 }
  0xe7   : > { %vm649_vm3 = vcmp.lt.f32.partialorder %v1376_v58, inf  ;;  %vm467_vm4 = vcmp.le.f32.partialorder %v428_v26, %v1376_v58  ;;  %vm468_vm5 = vcmp.le.f32.partialorder %v429_v23, %v1376_v58  ;;  %vm469_vm6 = vcmp.le.f32.partialorder %v430_v29, %v1376_v58  ;;  %v1073_v41 = vpop.trf.xlu2 }
  0xe8   : > { %v657_v1 = vsel %vm649_vm3, %v1376_v58, inf  ;;  %vm470_vm7 = vcmp.le.f32.partialorder %v431_v31, %v1376_v58  ;;  %vm471_vm8 = vcmp.le.f32.partialorder %v432_v27, %v1376_v58  ;;  %vm472_vm10 = vcmp.le.f32.partialorder %v1360_v24, %v1376_v58 }
  0xe9   : > { %vm664_vm9 = vcmp.ne.f32.partialorder %v657_v1, %v657_v1  ;;  %vm473_vm11 = vcmp.le.f32.partialorder %v434_v28, %v1376_v58  ;;  %v475_v4 = vsel %vm467_vm4, %v1371_v54, 64  ;;  %vm474_vm12 = vcmp.le.f32.partialorder %v435_v39, %v1376_v58 }
  0xea   : > { %v665_v2 = vsel %vm664_vm9, 0.0, %v657_v1  ;;  %v476_v5 = vsel %vm468_vm5, %v1374_v57, 64  ;;  %v477_v6 = vsel %vm469_vm6, %v1379_v59, 64  ;;  %v478_v7 = vsel %vm470_vm7, %v1382_v60, 64 }
  0xeb   : > { %vm666_vm14 = vcmp.eq.f32.partialorder %v665_v2, inf  ;;  %v479_v8 = vsel %vm471_vm8, %v1385_v61, 64  ;;  %v480_v10 = vsel %vm472_vm10, %v1390_v63, 64  ;;  %v481_v14 = vsel %vm473_vm11, %v1393_v0, 64 }
  0xec   : > { %v667_v9 = vsel %vm666_vm14, 3.4028235e+38, %v665_v2  ;;  %v483_v15 = vsel %vm436_vm1, %v475_v4, 2147483647  ;;  %v482_v17 = vsel %vm474_vm12, %v1397_v3, 64  ;;  %v734_v58 = vmul.f32 %v1317_v12, %v1317_v12 }
  0xed   : > { %vm668_vm15 = vcmp.eq.f32.partialorder %v667_v9, -inf  ;;  %v484_v18 = vsel %vm436_vm1, %v476_v5, 2147483647  ;;  %v485_v19 = vsel %vm436_vm1, %v477_v6, 2147483647 }
  0xee   : > { %v669_v20 = vsel %vm668_vm15, -3.4028235e+38, %v667_v9  ;;  %v486_v21 = vsel %vm436_vm1, %v478_v7, 2147483647  ;;  %v487_v22 = vsel %vm436_vm1, %v479_v8, 2147483647 }
  0xef   : > { %v670_v23 = vsel %vm293_vm13, %v669_v20, 0.0  ;;  %vm488_vm0 = vcmp.lt.s32.totalorder %v483_v15, %v487_v22  ;;  %v490_v24 = vsel %vm436_vm1, %v480_v10, 2147483647  ;;  %v493_v25 = vsel %vm436_vm1, %v481_v14, 2147483647  ;;  %v1074_v44 = vpop.trf.xlu2 }
  0xf0   : > { %v671_v26 = vsel %vm662_vm2, %v670_v23, 0.0  ;;  %v489_v27 = vsel %vm488_vm0, %v483_v15, %v487_v22  ;;  %vm491_vm4 = vcmp.lt.s32.totalorder %v484_v18, %v490_v24  ;;  %vm494_vm5 = vcmp.lt.s32.totalorder %v485_v19, %v493_v25 }
  0xf1   : > { %672 = vadd.xlane.f32.xlu0 %v671_v26  ;;  %v492_v28 = vsel %vm491_vm4, %v484_v18, %v490_v24  ;;  %v495_v29 = vsel %vm494_vm5, %v485_v19, %v493_v25  ;;  %v496_v30 = vsel %vm436_vm1, %v482_v17, 2147483647  ;;  %v731_v25 = vmul.f32 %v1319_v13, %v1319_v13 }
  0xf2   : > { %vm497_vm6 = vcmp.lt.s32.totalorder %v486_v21, %v496_v30  ;;  %vm499_vm7 = vcmp.lt.s32.totalorder %v489_v27, %v492_v28  ;;  %v732_v26 = vmul.f32 %v1323_v16, %v1323_v16 }
  0xf3   : > { %v498_v31 = vsel %vm497_vm6, %v486_v21, %v496_v30  ;;  %v500_v32 = vsel %vm499_vm7, %v489_v27, %v492_v28 }
  0xf4   : > { %vm501_vm8 = vcmp.lt.s32.totalorder %v495_v29, %v498_v31 }
  0xf5   : > { %v502_v33 = vsel %vm501_vm8, %v495_v29, %v498_v31  ;;  %v733_v31 = vmul.f32 %v1315_v11, %v1315_v11 }
  0xf6   : > { %vm503_vm9 = vcmp.lt.s32.totalorder %v500_v32, %v502_v33 }
  0xf7   : > { %v504_v34 = vsel %vm503_vm9, %v500_v32, %v502_v33  ;;  %v1075_v45 = vpop.trf.xlu2 }
  0xf8   : > { %v505_v35 = vrot.slane %v504_v34, 4 }
  0xfa   : > { %vm506_vm10 = vcmp.lt.s32.totalorder %v504_v34, %v505_v35 }
  0xfb   : > { %v507_v36 = vsel %vm506_vm10, %v504_v34, %v505_v35 }
  0xfc   : > { %v508_v37 = vrot.slane %v507_v36, 2 }
  0xfe   : > { %vm509_vm11 = vcmp.lt.s32.totalorder %v507_v36, %v508_v37 }
  0xff   : > { %v510_v38 = vsel %vm509_vm11, %v507_v36, %v508_v37  ;;  %v1076_v46 = vpop.trf.xlu2 }
 0x100   : > { %v511_v39 = vrot.slane %v510_v38, 1 }
 0x102   : > { %vm512_vm12 = vcmp.lt.s32.totalorder %v510_v38, %v511_v39 }
 0x103   : > { %v513_v40 = vsel %vm512_vm12, %v510_v38, %v511_v39 }
 0x104   : > { %vm520_vm14 = vcmp.eq.s32.totalorder %v1393_v0, %v513_v40  ;;  %vm521_vm15 = vcmp.eq.s32.totalorder %v1397_v3, %v513_v40  ;;  %vm518_vm4 = vcmp.eq.s32.totalorder %v1385_v61, %v513_v40  ;;  %vm519_vm5 = vcmp.eq.s32.totalorder %v1390_v63, %v513_v40 }
 0x105   : > { %vm970_vm0 = vmpackc.low %vm521_vm15, %vm520_vm14  ;;  %v656_v43 = vsel %vm649_vm3, %v513_v40, 0  ;;  %vm516_vm7 = vcmp.eq.s32.totalorder %v1379_v59, %v513_v40  ;;  %vm517_vm8 = vcmp.eq.s32.totalorder %v1382_v60, %v513_v40  ;;  %vm514_vm10 = vcmp.eq.s32.totalorder %v1371_v54, %v513_v40 }
 0x106   : > { %971 = vmatpush.bf16.msk.msra.mxu1 %vm970_vm0, %v1190_v42  ;;  %981 = vmatpush.bf16.msk.msra.mxu2 %vm970_vm0, %v1190_v42  ;;  %663 = vst.msk [vmem:[%s256_s24] sm:$0x1] %vm662_vm2, %v656_v43  ;;  %vm972_vm6 = vmpackc.low %vm519_vm5, %vm518_vm4  ;;  %vm515_vm11 = vcmp.eq.s32.totalorder %v1374_v57, %v513_v40  ;;  %vm578_vm14 = vcmask 523264   ;;  %v713_v57 = vsel %vm293_vm13, %v1315_v11, 0.0  ;;  %v714_v59 = vsel %vm293_vm13, %v1317_v12, 0.0 }
 0x107   : > { %vm974_vm9 = vmpackc.low %vm517_vm8, %vm516_vm7  ;;  %v715_v60 = vsel %vm436_vm1, %v711_v55, 0.0  ;;  %v716_v61 = vsel %vm436_vm1, %v712_v56, 0.0  ;;  %v718_v63 = vsel %vm436_vm1, %v713_v57, 0.0  ;;  %v720_v4 = vsel %vm436_vm1, %v714_v59, 0.0 }
 0x108   : > { %vm976_vm12 = vmpackc.low %vm515_vm11, %vm514_vm10  ;;  %v717_v3 = vadd.f32 %v716_v61, %v715_v60 }
 0x10a   : > { %973 = vmatpush.bf16.msk.msra.mxu1 %vm972_vm6, %v1190_v42  ;;  %983 = vmatpush.bf16.msk.msra.mxu2 %vm972_vm6, %v1190_v42  ;;  %v719_v2 = vadd.f32 %v718_v63, %v717_v3 }
 0x10c   : > { %v721_v7 = vadd.f32 %v720_v4, %v719_v2 }
 0x10e   : > { %975 = vmatpush.bf16.msk.msra.mxu1 %vm974_vm9, %v1190_v42  ;;  %985 = vmatpush.bf16.msk.msra.mxu2 %vm974_vm9, %v1190_v42 }
 0x10f   : > { %722 = vadd.xlane.f32.xlu0 %v721_v7 }
 0x112   : > { %977 = vmatpush.bf16.msk.msra.mxu1 %vm976_vm12, %v1190_v42  ;;  %987 = vmatpush.bf16.msk.msra.mxu2 %vm976_vm12, %v1190_v42  ;;  %v737_v42 = vsel %vm293_vm13, %v733_v31, 0.0 }
 0x115   : > { %978 = vmatmul.msk.bf16.vlgmr.msra.gmra.mxu1 %vm578_vm14, %v1074_v44  ;;  %988 = vmatmul.msk.bf16.vlgmr.msra.gmra.mxu2 %vm578_vm14, %v1073_v41 }
 0x125   : > { %979 = vmatmul.msk.bf16.gmra.mxu1 %vm578_vm14, %v1076_v46  ;;  %989 = vmatmul.msk.bf16.gmra.mxu2 %vm578_vm14, %v1075_v45 }
 0x164   : > { %v673_v47 = vpop.xlane.xlu0 %672 }
 0x165   : > { %v674_v48 = vrot.slane %v673_v47, 4 }
 0x167   : > { %v675_v49 = vadd.f32 %v674_v48, %v673_v47  ;;  %v742_v47 = vsel %vm436_vm1, %v737_v42, 0.0 }
 0x169   : > { %v676_v50 = vrot.slane %v675_v49, 2 }
 0x16b   : > { %v677_v51 = vadd.f32 %v676_v50, %v675_v49  ;;  %v738_v49 = vsel %vm293_vm13, %v734_v58, 0.0 }
 0x16c   : > { %v744_v50 = vsel %vm436_vm1, %v738_v49, 0.0 }
 0x16d   : > { %v678_v52 = vrot.slane %v677_v51, 1 }
 0x16f   : > { %v679_v53 = vadd.f32 %v678_v52, %v677_v51 }
 0x171   : > { %996 = vpush %v679_v53 }
 0x192   : > { %v594_v54 = vpop.f32.mrf.mxu1 }
 0x198   : > { %v639_v0 = vpop.f32.mrf.mxu2 }
 0x199   : > { %v640_v1 = vadd.f32 %v639_v0, %v594_v54 }
 0x19a   : > { %v596_v6 = vpop.f32.mrf.mxu1 }
 0x19b   : > { %v652_v5 = vsel %vm649_vm3, %v640_v1, 0.0 }
 0x19c   : > { %658 = vst.msk [vmem:[%s1468_s29] sm:$0xff] %vm436_vm1, %v652_v5  ;;  %v681_v19 = vsub.f32 %v652_v5, %v1319_v13  ;;  %v735_v13 = vsel %vm293_vm13, %v731_v25, 0.0 }
 0x19d   : > { %v739_v38 = vsel %vm436_vm1, %v735_v13, 0.0 }
 0x19e   : > { %v685_v23 = vmul.f32 %v681_v19, %v681_v19 }
 0x1a0   : > { %v641_v8 = vpop.f32.mrf.mxu2  ;;  %v691_v32 = vsel %vm293_vm13, %v685_v23, 0.0 }
 0x1a1   : > { %v642_v9 = vadd.f32 %v641_v8, %v596_v6  ;;  %v695_v36 = vsel %vm436_vm1, %v691_v32, 0.0 }
 0x1a2   : > { %v599_v14 = vpop.f32.mrf.mxu1 }
 0x1a3   : > { %v653_v10 = vsel %vm649_vm3, %v642_v9, 0.0 }
 0x1a4   : > { %659 = vst.msk [vmem:[%s1468_s29 + $0x8] sm:$0xff] %vm436_vm1, %v653_v10  ;;  %v682_v15 = vsub.f32 %v653_v10, %v1323_v16  ;;  %v736_v16 = vsel %vm293_vm13, %v732_v26, 0.0 }
 0x1a5   : > { %v740_v39 = vsel %vm436_vm1, %v736_v16, 0.0 }
 0x1a6   : > { %v686_v21 = vmul.f32 %v682_v15, %v682_v15  ;;  %v741_v45 = vadd.f32 %v740_v39, %v739_v38 }
 0x1a8   : > { %v644_v17 = vpop.f32.mrf.mxu2  ;;  %v692_v27 = vsel %vm293_vm13, %v686_v21, 0.0 }
 0x1a9   : > { %v645_v18 = vadd.f32 %v644_v17, %v599_v14  ;;  %v696_v35 = vsel %vm436_vm1, %v692_v27, 0.0 }
 0x1aa   : > { %v601_v28 = vpop.f32.mrf.mxu1  ;;  %v697_v41 = vadd.f32 %v696_v35, %v695_v36 }
 0x1ab   : > { %v654_v20 = vsel %vm649_vm3, %v645_v18, 0.0 }
 0x1ac   : > { %660 = vst.msk [vmem:[%s1468_s29 + $0x10] sm:$0xff] %vm436_vm1, %v654_v20  ;;  %v683_v22 = vsub.f32 %v654_v20, %v1315_v11 }
 0x1ae   : > { %v687_v24 = vmul.f32 %v683_v22, %v683_v22 }
 0x1b0   : > { %v646_v29 = vpop.f32.mrf.mxu2  ;;  %v693_v33 = vsel %vm293_vm13, %v687_v24, 0.0 }
 0x1b1   : > { %v647_v30 = vadd.f32 %v646_v29, %v601_v28  ;;  %v698_v37 = vsel %vm436_vm1, %v693_v33, 0.0 }
 0x1b2   : > { %v699_v44 = vadd.f32 %v698_v37, %v697_v41 }
 0x1b3   : > { %v655_v34 = vsel %vm649_vm3, %v647_v30, 0.0 }
 0x1b4   : > { %661 = vst.msk [vmem:[%s1468_s29 + $0x18] sm:$0xff] %vm436_vm1, %v655_v34  ;;  %v684_v11 = vsub.f32 %v655_v34, %v1317_v12  ;;  %v743_v12 = vadd.f32 %v742_v47, %v741_v45 }
 0x1b6   : > { %v688_v40 = vmul.f32 %v684_v11, %v684_v11  ;;  %v745_v51 = vadd.f32 %v744_v50, %v743_v12 }
 0x1b8   : > { %v694_v43 = vsel %vm293_vm13, %v688_v40, 0.0 }
 0x1b9   : > { %v700_v46 = vsel %vm436_vm1, %v694_v43, 0.0 }
 0x1ba   : > { %v701_v48 = vadd.f32 %v700_v46, %v699_v44 }
 0x1bc   : > { %702 = vadd.xlane.f32.xlu1 %v701_v48 }
 0x1c4   : > { %746 = vadd.xlane.f32.xlu1 %v745_v51 }
 0x1c5   : > { %1104 = shalt.err (!%p1101_p5)
}
 0x1c6   : > { %1004 = dma.vmem_to_hbm [thread:$0]  (%p1261_p4), %s799_s9, 16, %s801_s10, %s780_s11   ;;  %v723_v52 = vpop.xlane.xlu0 %722  ;;  %vm758_vm1 = vcmp.eq.s32.totalorder %v1387_v62, 1  ;;  %vm755_vm2 = vcmp.eq.s32.totalorder %v1387_v62, 0  ;;  %vm762_vm3 = vcmp.eq.s32.totalorder %v1387_v62, 2  ;;  %vm766_vm13 = vcmp.eq.s32.totalorder %v1387_v62, 3 }
 0x1c7   : > { %v724_v53 = vrot.slane %v723_v52, 4  ;;  %s997_s24 = spop %996  ;;  %s810_s10 = scalar_lea.hbm %s1587_s5, %s1179_s21 }
 0x1c8   : > { %v756_v14 = vstv %s997_s24  ;;  %s262_s11 = scalar_lea.vmem [#allocation4], %s1432_s17  ;;  %s814_s14 = sshll.u32 %s810_s10, 4  ;;  %s815_s14 = int_to_ptr.hbm [resolvable:$true] %s814_s14 }
 0x1c9   : > { %v725_v54 = vadd.f32 %v724_v53, %v723_v52  ;;  %v757_v18 = vsel %vm755_vm2, %v756_v14, 0.0  ;;  %s812_s12 = sshll.u32 %s262_s11, 4  ;;  %s784_s16 = scalar_lea.sflag [#allocation5], %s1432_s17  ;;  %s813_s12 = int_to_ptr.vmem [resolvable:$true] %s812_s12 }
 0x1ca   : > { %s1119_s25 = sshra.s32 %s815_s14, 4  ;;  %s1125_s24 = scalar_lea.hbm %s1587_s5, 2  ;;  %s1120_s25 = int_to_ptr.hbm [resolvable:$true] %s1119_s25 }
 0x1cb   : > { %v726_v55 = vrot.slane %v725_v54, 2  ;;  %s1121_s27 = scalar_lea.hbm %s1120_s25, 1  ;;  %p1126_p10 = scmp.lt.s32.totalorder %s1120_s25, %s1587_s5 }
 0x1cc   : > { %p1122_p6 = scmp.ne.s32.totalorder %s1120_s25, %s1121_s27  ;;  %p1127_p11 = scmp.lt.s32.totalorder %s1125_s24, %s1121_s27 }
 0x1cd   : > { %v727_v59 = vadd.f32 %v726_v55, %v725_v54 }
 0x1ce   : > { %p1123_p7 = pnand %p1122_p6, %p1261_p4  ;;  %p1128_p12 = por %p1127_p11, %p1126_p10 }
 0x1cf   : > { %v728_v63 = vrot.slane %v727_v59, 1 }
 0x1d0   : > { %p1124_p9 = pneg %p1123_p7 }
 0x1d1   : > { %v729_v2 = vadd.f32 %v728_v63, %v727_v59 }
 0x1d2   : > { %p1129_p13 = pnand %p1128_p12, %p1124_p9 }
 0x22f   : > { %v703_v56 = vpop.xlane.xlu1 %702 }
 0x230   : > { %v704_v57 = vrot.slane %v703_v56, 4 }
 0x232   : > { %v705_v60 = vadd.f32 %v704_v57, %v703_v56 }
 0x234   : > { %v706_v61 = vrot.slane %v705_v60, 2 }
 0x236   : > { %v707_v0 = vadd.f32 %v706_v61, %v705_v60 }
 0x237   : > { %v747_v3 = vpop.xlane.xlu1 %746 }
 0x238   : > { %v748_v1 = vrot.slane %v747_v3, 4  ;;  %v708_v4 = vrot.slane %v707_v0, 1 }
 0x23a   : > { %v749_v5 = vadd.f32 %v748_v1, %v747_v3  ;;  %v709_v6 = vadd.f32 %v708_v4, %v707_v0 }
 0x23c   : > { %v750_v7 = vrot.slane %v749_v5, 2  ;;  %998 = vpush %v709_v6 }
 0x23d   : > { %1000 = vpush %v729_v2 }
 0x23e   : > { %v751_v8 = vadd.f32 %v750_v7, %v749_v5 }
 0x240   : > { %v752_v9 = vrot.slane %v751_v8, 1 }
 0x242   : > { %v753_v10 = vadd.f32 %v752_v9, %v751_v8 }
 0x244   : > { %1002 = vpush %v753_v10 }
 0x26d   : > { %s999_s15 = spop %998 }
 0x26e   : > { %v759_v15 = vstv %s999_s15  ;;  %s1001_s7 = spop %1000 }
 0x26f   : > { %v760_v17 = vsel %vm758_vm1, %v759_v15, 0.0  ;;  %v763_v20 = vstv %s1001_s7 }
 0x270   : > { %v761_v19 = vadd.f32 %v760_v17, %v757_v18  ;;  %v764_v21 = vsel %vm762_vm3, %v763_v20, 0.0 }
 0x272   : > { %v765_v22 = vadd.f32 %v764_v21, %v761_v19 }
 0x275   : > { %s1003_s13 = spop %1002 }
 0x276   : > { %v767_v23 = vstv %s1003_s13 }
 0x277   : > { %v768_v24 = vsel %vm766_vm13, %v767_v23, 0.0 }
 0x278   : > { %v769_v25 = vadd.f32 %v768_v24, %v765_v22 }
 0x27a   : > { %770 = vst [vmem:[%s262_s11] sm:$0x1] %v769_v25 }
 0x27b   : > { %1132 = shalt.err (!%p1129_p13)
}
 0x27c   : > { %1005 = dma.vmem_to_hbm [thread:$0]  (%p1261_p4), %s813_s12, 16, %s815_s14, %s784_s16  }
 0x27d PF: > { %p1015_p0 = scmp.ge.s32.totalorder %s1187_s23, 2  ;;  %s837_s17 = sand.u32 1, %s1167_s18  }
 0x27e   : > { %s838_s8 = scalar_lea.sflag [#allocation3], %s837_s17 }
 0x27f   : > { %p1009_p1 = pnand %p1015_p0, %p1268_p8 }
 0x281   : > { %p1010_p2 = pneg %p1009_p1 }
 0x283   : > { %1158 = dma.done.wait (%p1010_p2), %s838_s8, 16  }
 0x284   : > { %1160 = vsyncadd (%p1010_p2), %s838_s8, 4294967280  ;;  %s847_s9 = scalar_lea.sflag [#allocation5], %s837_s17 }
 0x285   : > { %1162 = dma.done.wait (%p1010_p2), %s847_s9, 16  }
 0x286   : > { %1164 = vsyncadd (%p1010_p2), %s847_s9, 4294967280  ;;  %s22_s23 = sadd.s32 1, %s1187_s23   ;;  %s1590_s18 = smov %s1171_s19 }
 0x287   : > { %p19_p3 = scmp.ge.s32.totalorder %s22_s23, 4   ;;  %s1591_s19 = smov %s1175_s20 }
 0x288   : > { %s1592_s20 = smov %s1274_s6  ;;  %s1593_s21 = smov %s1183_s22 }
 0x289   : > { %s1594_s22 = smov %s1596_s26  ;;  %21 = sbr.rel (!%p19_p3) target bundleno = 6 (0x6), region = 96 }
 0x28e   :  { %852 = vsyncpa [#allocation3], 1 }
 0x28f   :  { %854 = vsyncpa [#allocation3 + $0x1], 1 }
 0x290   :  { %855 = vsyncpa [#allocation5], 1 }
 0x291   :  { %857 = vsyncpa [#allocation5 + $0x1], 1 }

</bundles_post_ra>
